<compile_context>
chip_gen: v7x
topology: tpu7x:2x2x1
jax: 0.10.0
libtpu: 0.0.40
codegen_flags: <defaults>
</compile_context>

<pallas_src>
import functools
import math

import jax
import jax.numpy as jnp
from jax import lax
from jax.experimental import pallas as pl
from jax.experimental.pallas import tpu as pltpu


def _pe_add_dropout_kernel(seed_ref, x_ref, pe_ref, o_ref, *,
                           dropout_rate, training, block_rows, row_width):
    # x_ref: (TB, S*D) VMEM tile of flattened activations.
    # pe_ref: (1, S*D) VMEM tile of the PE row, already in x's dtype.
    y = x_ref[...] + pe_ref[...]          # sublane broadcast of the PE row

    if training and dropout_rate > 0.0:
        # Counter-based hash PRNG (splitmix32-style).  One globally unique
        # counter per element => no seed collisions across grid steps or
        # batch indices; the user seed is mixed in with a golden-ratio stride.
        row = lax.broadcasted_iota(jnp.int32, y.shape, 0) + pl.program_id(0) * block_rows
        col = lax.broadcasted_iota(jnp.int32, y.shape, 1)
        ctr = (row * row_width + col).astype(jnp.uint32)
        h = ctr + seed_ref[0].astype(jnp.uint32) * jnp.uint32(0x9E3779B9)
        h = (h ^ (h >> 16)) * jnp.uint32(0x7FEB352D)
        h = (h ^ (h >> 15)) * jnp.uint32(0x846CA68B)
        h = h ^ (h >> 16)
        # Inverted dropout: keep with prob (1-p), scale kept values by 1/(1-p).
        # Integer-threshold compare -> no u32->f32 convert, no float multiply.
        thresh = jnp.uint32(min(int(round(dropout_rate * (2.0 ** 32))), 2 ** 32 - 1))
        keep = h >= thresh
        scale = jnp.asarray(1.0 / (1.0 - dropout_rate), dtype=y.dtype)
        y = jnp.where(keep, y * scale, jnp.zeros_like(y))

    o_ref[...] = y


class PositionalEncodingPallas:
    """JAX/Pallas equivalent of the PyTorch PositionalEncoding module."""

    # Per-tile byte budget for the x block (Pallas double-buffers each side,
    # so peak VMEM ~= 4-5x this; stays far under the 16/32 MiB scoped defaults
    # even before we raise vmem_limit_bytes).
    _ROW_TILE_BUDGET_BYTES = 4 * 1024 * 1024

    def __init__(self, d_model, dropout, max_len=120):
        self.d_model = d_model
        self.dropout = float(dropout)
        self.max_len = max_len
        # Fixed PE table (max_len, d_model) — deterministic, no learned params.
        position = jnp.arange(max_len, dtype=jnp.float32)[:, None]          # (L, 1)
        div_term = jnp.exp(
            jnp.arange(0, d_model, 2, dtype=jnp.float32)
            * (-math.log(10000.0) / d_model))                               # (D/2,)
        ang = position * div_term                                           # (L, D/2)
        pe = jnp.zeros((max_len, d_model), dtype=jnp.float32)
        pe = pe.at[:, 0::2].set(jnp.sin(ang))
        pe = pe.at[:, 1::2].set(jnp.cos(ang))
        self.pe = pe

    def __call__(self, x, *, training=False, seed=0):
        # x: (B, S, D)
        B, S, D = x.shape
        assert D == self.d_model and S <= self.max_len
        SD = S * D

        # Lane-dense 2D views; cast PE to x.dtype once (hoisted out of kernel).
        x2 = x.reshape(B, SD)
        pe2 = self.pe[:S].reshape(1, SD).astype(x.dtype)

        # Row-tile size: whole batch if it fits the budget, otherwise a
        # multiple-of-8 row block (keeps the (8,128) BlockSpec rule happy).
        bytes_per_row = SD * x.dtype.itemsize
        if B * bytes_per_row <= self._ROW_TILE_BUDGET_BYTES or B <= 8:
            tb = B
        else:
            tb = max(8, min(B, self._ROW_TILE_BUDGET_BYTES // bytes_per_row) // 8 * 8)
        grid = (pl.cdiv(B, tb),)

        kernel = functools.partial(
            _pe_add_dropout_kernel,
            dropout_rate=self.dropout,
            training=training,
            block_rows=tb,
            row_width=SD,
        )

        # NOTE: input_output_aliases={1: 0} (alias x -> out) would save one HBM
        # buffer in eval mode, but mutating the caller's x is surprising; skipped.
        out2 = pl.pallas_call(
            kernel,
            out_shape=jax.ShapeDtypeStruct((B, SD), x.dtype),
            grid_spec=pltpu.PrefetchScalarGridSpec(
                num_scalar_prefetch=1,            # dropout seed lives in SMEM
                grid=grid,
                in_specs=[
                    pl.BlockSpec((tb, SD), lambda r, seed_ref: (r, 0)),
                    pl.BlockSpec((1, SD), lambda r, seed_ref: (0, 0)),
                ],
                out_specs=pl.BlockSpec((tb, SD), lambda r, seed_ref: (r, 0)),
            ),
            compiler_params=pltpu.CompilerParams(
                # Row blocks are fully independent -> shard across TCs on v7x.
                dimension_semantics=("parallel",),
                # Allow big lane-dense tiles to double-buffer on v5e's 16 MiB
                # scoped default; 48 MiB is safe on all of v5e/v6e/v7x.
                vmem_limit_bytes=48 * 1024 * 1024,
            ),
        )(jnp.array([seed], dtype=jnp.int32), x2, pe2)

        return out2.reshape(B, S, D)


if __name__ == "__main__":
    # Small shapes consistent with the module: batch=2, seq=8, d_model=32.
    B, S, D = 2, 8, 32
    key = jax.random.PRNGKey(0)
    x = jax.random.normal(key, (B, S, D), dtype=jnp.float32)

    module = PositionalEncodingPallas(d_model=D, dropout=0.1, max_len=120)

    # Eval-mode forward (dropout is identity, matching module.eval() in torch).
    out = jax.block_until_ready(module(x, training=False))

    # Reference check in plain JAX.
    ref = x + module.pe[:S][None, :, :]
    assert out.shape == (B, S, D)
    assert jnp.allclose(out, ref, atol=1e-6), "mismatch vs reference (eval)"

    # Training (stochastic dropout) path: every surviving element must equal
    # ref / (1 - p); dropped elements are exactly zero.
    out_train = jax.block_until_ready(module(x, training=True, seed=123))
    assert out_train.shape == (B, S, D)
    kept = out_train != 0
    scaled_ref = ref / (1.0 - module.dropout)
    assert jnp.allclose(jnp.where(kept, out_train, 0.0),
                        jnp.where(kept, scaled_ref, 0.0), atol=1e-5), \
        "mismatch vs reference (train)"

    print("KERNEL_OK")
</pallas_src>

<mosaic_0001>
module attributes {stable_mosaic.version = 11 : i64} {
  func.func @_pe_add_dropout_kernel(%arg0: i32, %arg1: memref<1xi32, #tpu.memory_space<smem>>, %arg2: memref<2x256xf32, #tpu.memory_space<vmem>>, %arg3: memref<1x256xf32, #tpu.memory_space<vmem>>, %arg4: memref<2x256xf32, #tpu.memory_space<vmem>>) attributes {dimension_semantics = [#tpu.dimension_semantics<parallel>], iteration_bounds = array<i64: 1>, scalar_prefetch = 1 : i64, scratch_operands = 0 : i64, tpu.core_type = #tpu.core_type<tc>, window_params = [{transform_indices = @transform_0, window_bounds = array<i64: 2, 256>}, {pipeline_mode = #tpu.pipeline_mode<synchronous>, transform_indices = @transform_1, window_bounds = array<i64: 1, 256>}, {transform_indices = @transform_2, window_bounds = array<i64: 2, 256>}]} {
    %c0 = arith.constant 0 : index
    %c0_0 = arith.constant 0 : index
    %0 = vector.load %arg2[%c0, %c0_0] : memref<2x256xf32, #tpu.memory_space<vmem>>, vector<2x256xf32>
    %c0_1 = arith.constant 0 : index
    %c0_2 = arith.constant 0 : index
    %1 = vector.load %arg3[%c0_1, %c0_2] : memref<1x256xf32, #tpu.memory_space<vmem>>, vector<1x256xf32>
    %2 = vector.broadcast %1 : vector<1x256xf32> to vector<2x256xf32>
    %3 = arith.addf %0, %2 : vector<2x256xf32>
    %c0_3 = arith.constant 0 : index
    %c0_4 = arith.constant 0 : index
    %4 = vector.load %arg4[%c0_3, %c0_4] : memref<2x256xf32, #tpu.memory_space<vmem>>, vector<2x256xf32>
    tpu.vector_store %arg4[%c0_3, %c0_4], %3 {strides = array<i32>} : memref<2x256xf32, #tpu.memory_space<vmem>>, vector<2x256xf32>,
    return
  }
  func.func @transform_0(%arg0: i32, %arg1: memref<1xi32, #tpu.memory_space<smem>>) -> (i32, i32) {
    %c0_i32 = arith.constant 0 : i32
    %c0_i32_0 = arith.constant 0 : i32
    return %arg0, %c0_i32 : i32, i32
  }
  func.func @transform_1(%arg0: i32, %arg1: memref<1xi32, #tpu.memory_space<smem>>) -> (i32, i32) {
    %c0_i32 = arith.constant 0 : i32
    %c0_i32_0 = arith.constant 0 : i32
    %c0_i32_1 = arith.constant 0 : i32
    return %c0_i32, %c0_i32_0 : i32, i32
  }
  func.func @transform_2(%arg0: i32, %arg1: memref<1xi32, #tpu.memory_space<smem>>) -> (i32, i32) {
    %c0_i32 = arith.constant 0 : i32
    %c0_i32_0 = arith.constant 0 : i32
    return %arg0, %c0_i32 : i32, i32
  }
}

</mosaic_0001>

<bundles_post_ra>
// kernel: tpu_custom_call.1
= control target key start
LH: loop header
LB: loop body
LE: loop exit
PB: predicated region body
PF: predicated region fallthrough
CT: control target
= control target key end

     0   :  { %9 = vsyncpa [#allocation5], 0  ;;  %s164_s0 = inlined_call_operand.<no memory space> [shape: s32[1], index: 0, kind: input, shape index: {}]   ;;  %s165_s1 = inlined_call_operand.hbm [shape: f32[2,256], index: 1, kind: input, shape index: {}]   ;;  %s166_s2 = inlined_call_operand.vmem [shape: f32[1,256], index: 2, kind: input, shape index: {}]   ;;  %s167_s3 = inlined_call_operand.hbm [shape: f32[2,256], index: 3, kind: output, shape index: {}]  }
   0x1   :  { %10 = vsyncpa [#allocation6], 0  ;;  %s114_s12 = smov [#allocation4]   ;;  %s66_s16 = scalar_lea.hbm %s165_s1, 64 }
   0x2   :  { %s17_s13 = sshll.u32 %s114_s12, 4  ;;  %p67_p0 = scmp.ne.s32.totalorder %s165_s1, %s66_s16  ;;  %s18_s13 = int_to_ptr.vmem [resolvable:$true] %s17_s13 }
   0x3   :  { %p70_p1 = scmp.lt.u32.totalorder %s66_s16, %s165_s1 }
   0x5   :  { %p72_p2 = pnand %p70_p1, %p67_p0 }
   0x7   :  { %75 = shalt.err (!%p72_p2)
}
   0x8   :  { %s76_s20 = scalar_lea.vmem %s18_s13, 64  ;;  %p81_p4 = scmp.lt.s32.totalorder %s18_s13, %s18_s13 }
   0x9   :  { %p77_p3 = scmp.ne.s32.totalorder %s18_s13, %s76_s20  ;;  %p82_p5 = scmp.lt.s32.totalorder %s76_s20, %s76_s20 }
   0xb   :  { %p83_p6 = por %p82_p5, %p81_p4 }
   0xd   :  { %p84_p7 = pnand %p83_p6, %p77_p3 }
   0xf   :  { %87 = shalt.err (!%p84_p7)
}
  0x10   :  { %20 = dma.hbm_to_vmem [thread:$0]  %s165_s1, 64, %s18_s13, [#allocation5]  }
  0x11   :  { %110 = dma.done.wait [#allocation5], 64  }
  0x12   :  { %111 = vsyncadd [#allocation5], 4294967232  ;;  %v29_v0 = vlaneseq  ;;  %v115_v1 = vmov 1983009808   ;;  %v27_v7 = vld [vmem:[%s166_s2] sm:$0x3] }
  0x13   :  { %v39_v2 = vunpack.c.l.s4 %v115_v1  ;;  %v26_v12 = vld [vmem:[#allocation4] sm:$0xf]  ;;  %s116_s25 = smov [#allocation7]  }
  0x14   :  { %v30_v3 = vshrl.u32 %v29_v0, 7  ;;  %s54_s1 = sshll.u32 %s116_s25, 4  ;;  %s55_s1 = int_to_ptr.vmem [resolvable:$true] %s54_s1 }
  0x15   :  { %v40_v6 = vunpack.c.0.s8 %v39_v2  ;;  %s88_s26 = scalar_lea.vmem %s55_s1, 64  ;;  %p93_p9 = scmp.lt.s32.totalorder %s55_s1, %s55_s1 }
  0x16   :  { %v31_v4 = vsub.s32 0, %v30_v3  ;;  %v35_v5 = vsub.s32 1, %v30_v3  ;;  %p89_p8 = scmp.ne.s32.totalorder %s55_s1, %s88_s26  ;;  %p94_p10 = scmp.lt.s32.totalorder %s88_s26, %s88_s26 }
  0x17   :  { %v43_v10 = vsub.s32 %v40_v6, %v30_v3 }
  0x18   :  { %v32_v8 = vrot.slane %v27_v7, %v31_v4  ;;  %v36_v9 = vrot.slane %v27_v7, %v35_v5  ;;  %p95_p11 = por %p94_p10, %p93_p9 }
  0x1a   :  { %v37_v11 = vcombine.low %v32_v8, %v36_v9  ;;  %p96_p12 = pnand %p95_p11, %p89_p8 }
  0x1c   :  { %v44_v13 = vrot.slane %v37_v11, %v43_v10 }
  0x1e   :  { %v46_v14 = vadd.f32 %v44_v13, %v26_v12 }
  0x20   :  { %47 = vst [vmem:[#allocation7] sm:$0xf] %v46_v14 }
  0x21   :  { %99 = shalt.err (!%p96_p12)
}
  0x22   :  { %s100_s28 = scalar_lea.hbm %s167_s3, 64 }
  0x23   :  { %p101_p13 = scmp.ne.s32.totalorder %s167_s3, %s100_s28  ;;  %p104_p0 = scmp.lt.u32.totalorder %s100_s28, %s167_s3 }
  0x25   :  { %p106_p1 = pnand %p104_p0, %p101_p13 }
  0x27   :  { %109 = shalt.err (!%p106_p1)
}
  0x28   :  { %57 = dma.vmem_to_hbm [thread:$0]  %s55_s1, 64, %s167_s3, [#allocation6]  }
  0x29   :  { %112 = dma.done.wait [#allocation6], 64  }
  0x2a   :  { %113 = vsyncadd [#allocation6], 4294967232 }
  0x2b   :  { %61 = vsyncpa [#allocation5], 1 }
  0x2c   :  { %62 = vsyncpa [#allocation6], 1 }

</bundles_post_ra>
